<compile_context>
chip_gen: v7x
topology: tpu7x:2x2x1
jax: 0.10.0
libtpu: 0.0.40
codegen_flags: <defaults>
</compile_context>

<pallas_src>
import numpy as np
import jax
import jax.numpy as jnp
from jax.experimental import pallas as pl
from jax.experimental.pallas import tpu as pltpu

_EPS = float(np.finfo(np.float32).eps)   # CorrCholeskyTransform clamp eps
_NEG_SLOPE = 0.01                        # F.leaky_relu negative_slope
_SP_HI = 20.0                            # F.softplus threshold (x > 20 -> x)
_SP_LO = -15.0                           # deep tail: softplus(x) == exp(x) to f32 accuracy


def _deep_normal_kernel(x_ref, w_si_ref, b_si_ref, w1_ref, b1_ref, w2_ref, b2_ref,
                        prefix_ref, cfin_ref, psig_ref, out_ref):
    x = x_ref[...]                                    # (Bt, n_in) f32
    HS = w_si_ref.shape[1]                            # H + 1 (shared lanes + io lane)
    H = HS - 1
    HOUT = w2_ref.shape[1]                            # H + TRIL + H
    TRIL = HOUT - 2 * H

    def mm(a, b_ref):
        return jnp.dot(a, b_ref[...], preferred_element_type=jnp.float32)

    # ---- shared trunk, with input_to_output fused in as one extra lane ----------
    sx = mm(x, w_si_ref) + b_si_ref[...]                              # (Bt, H+1)
    lane_s = jax.lax.broadcasted_iota(jnp.int32, sx.shape, 1)
    shared_full = jnp.where(lane_s < H, jnp.tanh(sx), sx)             # tanh shared, raw io lane

    # ---- all three heads: one fused matmul + one block-diagonal matmul ----------
    heads1 = jnp.tanh(mm(shared_full, w1_ref) + b1_ref[...])          # (Bt, 3H); io -> zero row
    heads2 = mm(heads1, w2_ref) + b2_ref[...]                         # (Bt, HOUT)

    lane = jax.lax.broadcasted_iota(jnp.int32, heads2.shape, 1)
    is_mean = lane < H
    is_elem = (lane >= H) & (lane < H + TRIL)
    is_diag = lane >= H + TRIL

    # cho off-diagonal head: leaky_relu -> tanh -> clamp (CorrCholeskyTransform input)
    lr = jnp.where(heads2 >= 0.0, heads2, _NEG_SLOPE * heads2)
    t = jnp.clip(jnp.tanh(lr), -1.0 + _EPS, 1.0 - _EPS)
    t = jnp.where(is_elem, t, 0.0)                                    # packed tril values only

    # cho diagonal head: softplus with F.softplus threshold + deep-tail semantics
    sp_mid = jnp.log(1.0 + jnp.exp(jnp.clip(heads2, _SP_LO, _SP_HI)))
    sp = jnp.where(heads2 > _SP_HI, heads2,
                   jnp.where(heads2 < _SP_LO, jnp.exp(heads2), sp_mid))
    d = jnp.where(is_diag, sp, 0.0)

    # ---- CorrCholeskyTransform stick-breaking in the packed-tril domain ---------
    # prefix_ref is the strict per-row prefix mask over the packed tril lanes (zero outside
    # that block): csum[b, e(i,j)] = sum_{k<j} 0.5*log(1 - t[i,k]^2).  log(1 - t*t) matches
    # log1p(-t*t) to f32 accuracy over the clamped range (see header note).
    logs = 0.5 * jnp.log(1.0 - t * t)                                 # 0 in non-elem lanes
    csum = mm(logs, prefix_ref)                                       # (Bt, HOUT)
    y = t * jnp.exp(csum)                                             # off-diag factor values

    combined = jnp.where(is_mean, heads2, 0.0) + y + d                # disjoint lane segments

    # sigmoid(input_to_output(x)), kept on its io lane only (EUP reciprocal, ~1e-4 rel.)
    sig = pl.reciprocal(1.0 + jnp.exp(-shared_full), approx=True)
    sig = jnp.where(lane_s == H, sig, 0.0)

    # ---- single lane-dense output: [mean | r*cho (flat row-major) | sigmoid] ----
    # cfin places mean (identity), r*tril-scatter and r*diag-embed; psig places the sigmoid.
    out_ref[...] = mm(combined, cfin_ref) + mm(sig, psig_ref)


def init_params(key, n_in, H):
    """Deterministic PyTorch-Linear-style init: U(-1/sqrt(fan_in), +1/sqrt(fan_in))."""
    tril = H * (H - 1) // 2

    def lin(k, fan_in, fan_out):
        k1, k2 = jax.random.split(k)
        bound = 1.0 / np.sqrt(fan_in)
        w = jax.random.uniform(k1, (fan_in, fan_out), jnp.float32, -bound, bound)
        b = jax.random.uniform(k2, (1, fan_out), jnp.float32, -bound, bound)
        return w, b

    keys = jax.random.split(key, 8)
    p = {}
    p["w_shared"], p["b_shared"] = lin(keys[0], n_in, H)
    p["w_mean_hidden"], p["b_mean_hidden"] = lin(keys[1], H, H)
    p["w_mean_linear"], p["b_mean_linear"] = lin(keys[2], H, H)
    p["w_cho_hidden"], p["b_cho_hidden"] = lin(keys[3], H, H)
    p["w_cho_elements"], p["b_cho_elements"] = lin(keys[4], H, tril)
    p["w_cho_diag_hidden"], p["b_cho_diag_hidden"] = lin(keys[5], H, H)
    p["w_cho_diag"], p["b_cho_diag"] = lin(keys[6], H, H)
    p["w_input_to_output"], p["b_input_to_output"] = lin(keys[7], n_in, 1)
    p["radius"] = jnp.asarray(2.0, jnp.float32)       # fixed_target: t_radius = 2.0
    return p


def pack_params(p):
    """One-time packing of weights + constant placement matrices (kept off the hot path).

    |radius| is folded into the placement constants.
    # TODO(synk): re-pack (or pass radius as an SMEM scalar again) if radius is trained.
    """
    n_in, H = p["w_shared"].shape
    tril = H * (H - 1) // 2
    HH = H * H
    HS = H + 1
    H3 = 3 * H
    HOUT = H + tril + H
    OUT_W = H + HH + 1
    r_val = abs(float(p["radius"]))

    # shared + input_to_output fused into one (n_in, H+1) weight
    w_si = jnp.concatenate([p["w_shared"], p["w_input_to_output"]], axis=1)
    b_si = jnp.concatenate([p["b_shared"], p["b_input_to_output"]], axis=1)

    # fused first-level head weights; extra zero row so the raw io lane contributes nothing
    w1 = jnp.concatenate([p["w_mean_hidden"], p["w_cho_hidden"], p["w_cho_diag_hidden"]], axis=1)
    w1p = jnp.concatenate([w1, jnp.zeros((1, H3), jnp.float32)], axis=0)          # (H+1, 3H)
    b1 = jnp.concatenate([p["b_mean_hidden"], p["b_cho_hidden"], p["b_cho_diag_hidden"]], axis=1)

    # block-diagonal second-level head weights: heads1 -> [mean | cho_elements | cho_diag]
    w2 = jnp.zeros((H3, HOUT), jnp.float32)
    w2 = w2.at[0:H, 0:H].set(p["w_mean_linear"])
    w2 = w2.at[H:2 * H, H:H + tril].set(p["w_cho_elements"])
    w2 = w2.at[2 * H:, H + tril:].set(p["w_cho_diag"])
    b2 = jnp.concatenate([p["b_mean_linear"], p["b_cho_elements"], p["b_cho_diag"]], axis=1)

    # strict per-row prefix mask over the packed tril lanes (block at lanes [H, H+tril))
    prefix = np.zeros((HOUT, HOUT), np.float32)
    for i in range(1, H):
        base = H + i * (i - 1) // 2
        for j in range(i):
            for k in range(j):
                prefix[base + k, base + j] = 1.0

    # final placement: mean passthrough | r*tril-scatter + r*diag-embed | (sigmoid col = 0)
    c_final = np.zeros((HOUT, OUT_W), np.float32)
    for j in range(H):
        c_final[j, j] = 1.0
    for i in range(1, H):
        base = H + i * (i - 1) // 2
        for j in range(i):
            c_final[base + j, H + i * H + j] = r_val
    for i in range(H):
        c_final[H + tril + i, H + i * H + i] = r_val

    # sigmoid placement: io lane (index H of the shared tile) -> output lane H + HH
    p_sig = np.zeros((HS, OUT_W), np.float32)
    p_sig[H, H + HH] = 1.0

    return {
        "w_si": w_si, "b_si": b_si, "w1p": w1p, "b1": b1, "w2": w2, "b2": b2,
        "prefix": jnp.asarray(prefix), "c_final": jnp.asarray(c_final),
        "p_sig": jnp.asarray(p_sig), "radius": p["radius"],
    }


def _default_b_tile(B):
    """Batch tile: big tiles amortize the ~0.35us/step grid overhead; at large B keep
    >= 2 grid steps so the 'parallel' batch axis can shard across v7x's two TensorCores."""
    if B <= 1024:
        return B
    hi = min(2048, (B // 2) // 8 * 8)
    for t in range(hi, 7, -8):
        if B % t == 0:
            return t
    return B          # awkward batch size: fall back to one full-batch tile


def deep_normal_forward(x, packed, *, b_tile=None):
    B, n_in = x.shape
    HS = packed["w_si"].shape[1]
    H = HS - 1
    HH = H * H
    H3 = packed["w2"].shape[0]
    HOUT = packed["w2"].shape[1]
    OUT_W = packed["c_final"].shape[1]

    if b_tile is None:
        b_tile = _default_b_tile(B)
    assert B % b_tile == 0, "batch must be divisible by the batch tile"
    assert b_tile == B or b_tile % 8 == 0
    n_b = B // b_tile

    def const(shape):
        return pl.BlockSpec(shape, lambda b: (0, 0))   # weights/constants stay VMEM-resident

    grid_spec = pltpu.PrefetchScalarGridSpec(
        num_scalar_prefetch=0,
        grid=(n_b,),
        in_specs=[
            pl.BlockSpec((b_tile, n_in), lambda b: (b, 0)),   # x
            const((n_in, HS)),                                 # [w_shared | w_io]
            const((1, HS)),
            const((HS, H3)),                                   # fused head hidden (+ zero io row)
            const((1, H3)),
            const((H3, HOUT)),                                 # block-diagonal head output
            const((1, HOUT)),
            const((HOUT, HOUT)),                               # packed-tril prefix mask
            const((HOUT, OUT_W)),                              # final placement (|radius| folded in)
            const((HS, OUT_W)),                                # sigmoid placement
        ],
        out_specs=pl.BlockSpec((b_tile, OUT_W), lambda b: (b, 0)),
    )

    out = pl.pallas_call(
        _deep_normal_kernel,
        out_shape=jax.ShapeDtypeStruct((B, OUT_W), jnp.float32),
        grid_spec=grid_spec,
        compiler_params=pltpu.CompilerParams(dimension_semantics=("parallel",)),
    )(x, packed["w_si"], packed["b_si"], packed["w1p"], packed["b1"],
      packed["w2"], packed["b2"], packed["prefix"], packed["c_final"], packed["p_sig"])

    mean = out[:, :H]
    cho_scaled = out[:, H:H + HH].reshape(B, H, H)     # row-major reshape -> PyTorch layout
    sig = out[:, H + HH:H + HH + 1]
    r = jnp.abs(packed["radius"])
    return mean, cho_scaled, r, sig


def _reference_forward(x, p):
    """Pure-JAX mirror of DeepNormalModel.forward (mod == 'fixed_target')."""
    hp = jax.lax.Precision.HIGHEST

    def lin(v, w, b):
        return jnp.dot(v, w, precision=hp) + b

    shared_2 = jnp.tanh(lin(x, p["w_shared"], p["b_shared"]))
    mean = lin(jnp.tanh(lin(shared_2, p["w_mean_hidden"], p["b_mean_hidden"])),
               p["w_mean_linear"], p["b_mean_linear"])
    ce = lin(jnp.tanh(lin(shared_2, p["w_cho_hidden"], p["b_cho_hidden"])),
             p["w_cho_elements"], p["b_cho_elements"])
    ce = jnp.where(ce >= 0.0, ce, _NEG_SLOPE * ce)
    t = jnp.clip(jnp.tanh(ce), -1.0 + _EPS, 1.0 - _EPS)
    cd = lin(jnp.tanh(lin(shared_2, p["w_cho_diag_hidden"], p["b_cho_diag_hidden"])),
             p["w_cho_diag"], p["b_cho_diag"])
    cho_d1 = jax.nn.softplus(cd)

    B = x.shape[0]
    H = mean.shape[1]
    ii, jj = np.tril_indices(H, k=-1)
    r_mat = jnp.zeros((B, H, H), jnp.float32).at[:, ii, jj].set(t)
    z = r_mat * r_mat
    csum = 0.5 * jnp.cumsum(jnp.log1p(-z), axis=-1)
    mult = jnp.concatenate([jnp.ones((B, H, 1), jnp.float32),
                            jnp.exp(csum[:, :, :-1])], axis=-1)
    cho = r_mat * mult
    d = np.arange(H)
    cho = cho.at[:, d, d].set(cho_d1)

    r = jnp.abs(p["radius"])
    cho_scaled = r * cho
    sig = jax.nn.sigmoid(lin(x, p["w_input_to_output"], p["b_input_to_output"]))
    return mean, cho_scaled, r, sig


if __name__ == "__main__":
    B, n_in, H = 8, 16, 8
    key = jax.random.PRNGKey(0)
    kx, kp = jax.random.split(key)
    x = jax.random.normal(kx, (B, n_in), jnp.float32)
    params = init_params(kp, n_in, H)
    packed = pack_params(params)

    fwd = jax.jit(deep_normal_forward)
    mean, cho, r, sig = fwd(x, packed)
    jax.block_until_ready((mean, cho, r, sig))

    assert mean.shape == (B, H)
    assert cho.shape == (B, H, H)
    assert r.shape == ()
    assert sig.shape == (B, 1)
    # strictly-upper triangle of the (scaled) Cholesky factor must be exactly zero
    assert np.allclose(np.triu(np.asarray(cho), k=1), 0.0)

    # numerical check against a pure-JAX reference of the PyTorch forward
    mean_r, cho_r, r_r, sig_r = _reference_forward(x, params)
    np.testing.assert_allclose(np.asarray(mean), np.asarray(mean_r), rtol=5e-3, atol=5e-3)
    np.testing.assert_allclose(np.asarray(cho), np.asarray(cho_r), rtol=5e-3, atol=5e-3)
    np.testing.assert_allclose(np.asarray(r), np.asarray(r_r), rtol=1e-6, atol=1e-6)
    np.testing.assert_allclose(np.asarray(sig), np.asarray(sig_r), rtol=5e-3, atol=5e-3)

    print("KERNEL_OK")
</pallas_src>

<mosaic_0001>
module attributes {stable_mosaic.version = 11 : i64} {
  func.func @_deep_normal_kernel(%arg0: i32, %arg1: memref<8x16xf32, #tpu.memory_space<vmem>>, %arg2: memref<16x9xf32, #tpu.memory_space<vmem>>, %arg3: memref<1x9xf32, #tpu.memory_space<vmem>>, %arg4: memref<9x24xf32, #tpu.memory_space<vmem>>, %arg5: memref<1x24xf32, #tpu.memory_space<vmem>>, %arg6: memref<24x44xf32, #tpu.memory_space<vmem>>, %arg7: memref<1x44xf32, #tpu.memory_space<vmem>>, %arg8: memref<44x44xf32, #tpu.memory_space<vmem>>, %arg9: memref<44x73xf32, #tpu.memory_space<vmem>>, %arg10: memref<9x73xf32, #tpu.memory_space<vmem>>, %arg11: memref<8x73xf32, #tpu.memory_space<vmem>>) attributes {dimension_semantics = [#tpu.dimension_semantics<parallel>], iteration_bounds = array<i64: 1>, scalar_prefetch = 0 : i64, scratch_operands = 0 : i64, tpu.core_type = #tpu.core_type<tc>, window_params = [{transform_indices = @transform_0, window_bounds = array<i64: 8, 16>}, {pipeline_mode = #tpu.pipeline_mode<synchronous>, transform_indices = @transform_1, window_bounds = array<i64: 16, 9>}, {pipeline_mode = #tpu.pipeline_mode<synchronous>, transform_indices = @transform_2, window_bounds = array<i64: 1, 9>}, {pipeline_mode = #tpu.pipeline_mode<synchronous>, transform_indices = @transform_3, window_bounds = array<i64: 9, 24>}, {pipeline_mode = #tpu.pipeline_mode<synchronous>, transform_indices = @transform_4, window_bounds = array<i64: 1, 24>}, {pipeline_mode = #tpu.pipeline_mode<synchronous>, transform_indices = @transform_5, window_bounds = array<i64: 24, 44>}, {pipeline_mode = #tpu.pipeline_mode<synchronous>, transform_indices = @transform_6, window_bounds = array<i64: 1, 44>}, {pipeline_mode = #tpu.pipeline_mode<synchronous>, transform_indices = @transform_7, window_bounds = array<i64: 44, 44>}, {pipeline_mode = #tpu.pipeline_mode<synchronous>, transform_indices = @transform_8, window_bounds = array<i64: 44, 73>}, {pipeline_mode = #tpu.pipeline_mode<synchronous>, transform_indices = @transform_9, window_bounds = array<i64: 9, 73>}, {transform_indices = @transform_10, window_bounds = array<i64: 8, 73>}]} {
    %c0 = arith.constant 0 : index
    %c0_0 = arith.constant 0 : index
    %0 = vector.load %arg1[%c0, %c0_0] : memref<8x16xf32, #tpu.memory_space<vmem>>, vector<8x16xf32>
    %c0_1 = arith.constant 0 : index
    %c0_2 = arith.constant 0 : index
    %1 = vector.load %arg2[%c0_1, %c0_2] : memref<16x9xf32, #tpu.memory_space<vmem>>, vector<16x9xf32>
    %cst = arith.constant dense<0.000000e+00> : vector<8x9xf32>
    %2 = tpu.matmul %0, %1, %cst {dimension_numbers = #tpu.dot_dimension_numbers<[1], [0], [0], [1], [0, 0, 1, 1], [], []>} : vector<8x16xf32>, vector<16x9xf32>, vector<8x9xf32> -> vector<8x9xf32>
    %c0_3 = arith.constant 0 : index
    %c0_4 = arith.constant 0 : index
    %3 = vector.load %arg3[%c0_3, %c0_4] : memref<1x9xf32, #tpu.memory_space<vmem>>, vector<1x9xf32>
    %4 = vector.broadcast %3 : vector<1x9xf32> to vector<8x9xf32>
    %5 = arith.addf %2, %4 : vector<8x9xf32>
    %6 = tpu.iota {dimensions = array<i32: 1>} : vector<8x9xi32>
    %c8_i32 = arith.constant 8 : i32
    %7 = vector.broadcast %c8_i32 : i32 to vector<8x9xi32>
    %8 = arith.cmpi slt, %6, %7 : vector<8x9xi32>
    %9 = math.tanh %5 : vector<8x9xf32>
    %10 = arith.select %8, %9, %5 : vector<8x9xi1>, vector<8x9xf32>
    %c0_5 = arith.constant 0 : index
    %c0_6 = arith.constant 0 : index
    %11 = vector.load %arg4[%c0_5, %c0_6] : memref<9x24xf32, #tpu.memory_space<vmem>>, vector<9x24xf32>
    %cst_7 = arith.constant dense<0.000000e+00> : vector<8x24xf32>
    %12 = tpu.matmul %10, %11, %cst_7 {dimension_numbers = #tpu.dot_dimension_numbers<[1], [0], [0], [1], [0, 0, 1, 1], [], []>} : vector<8x9xf32>, vector<9x24xf32>, vector<8x24xf32> -> vector<8x24xf32>
    %c0_8 = arith.constant 0 : index
    %c0_9 = arith.constant 0 : index
    %13 = vector.load %arg5[%c0_8, %c0_9] : memref<1x24xf32, #tpu.memory_space<vmem>>, vector<1x24xf32>
    %14 = vector.broadcast %13 : vector<1x24xf32> to vector<8x24xf32>
    %15 = arith.addf %12, %14 : vector<8x24xf32>
    %16 = math.tanh %15 : vector<8x24xf32>
    %c0_10 = arith.constant 0 : index
    %c0_11 = arith.constant 0 : index
    %17 = vector.load %arg6[%c0_10, %c0_11] : memref<24x44xf32, #tpu.memory_space<vmem>>, vector<24x44xf32>
    %cst_12 = arith.constant dense<0.000000e+00> : vector<8x44xf32>
    %18 = tpu.matmul %16, %17, %cst_12 {dimension_numbers = #tpu.dot_dimension_numbers<[1], [0], [0], [1], [0, 0, 1, 1], [], []>} : vector<8x24xf32>, vector<24x44xf32>, vector<8x44xf32> -> vector<8x44xf32>
    %c0_13 = arith.constant 0 : index
    %c0_14 = arith.constant 0 : index
    %19 = vector.load %arg7[%c0_13, %c0_14] : memref<1x44xf32, #tpu.memory_space<vmem>>, vector<1x44xf32>
    %20 = vector.broadcast %19 : vector<1x44xf32> to vector<8x44xf32>
    %21 = arith.addf %18, %20 : vector<8x44xf32>
    %22 = tpu.iota {dimensions = array<i32: 1>} : vector<8x44xi32>
    %c8_i32_15 = arith.constant 8 : i32
    %23 = vector.broadcast %c8_i32_15 : i32 to vector<8x44xi32>
    %24 = arith.cmpi slt, %22, %23 : vector<8x44xi32>
    %c8_i32_16 = arith.constant 8 : i32
    %25 = vector.broadcast %c8_i32_16 : i32 to vector<8x44xi32>
    %26 = arith.cmpi sge, %22, %25 : vector<8x44xi32>
    %c36_i32 = arith.constant 36 : i32
    %27 = vector.broadcast %c36_i32 : i32 to vector<8x44xi32>
    %28 = arith.cmpi slt, %22, %27 : vector<8x44xi32>
    %29 = arith.andi %26, %28 : vector<8x44xi1>
    %c36_i32_17 = arith.constant 36 : i32
    %30 = vector.broadcast %c36_i32_17 : i32 to vector<8x44xi32>
    %31 = arith.cmpi sge, %22, %30 : vector<8x44xi32>
    %cst_18 = arith.constant 0.000000e+00 : f32
    %32 = vector.broadcast %cst_18 : f32 to vector<8x44xf32>
    %33 = arith.cmpf oge, %21, %32 : vector<8x44xf32>
    %cst_19 = arith.constant 0.00999999977 : f32
    %34 = vector.broadcast %cst_19 : f32 to vector<8x44xf32>
    %35 = arith.mulf %34, %21 : vector<8x44xf32>
    %36 = arith.select %33, %21, %35 : vector<8x44xi1>, vector<8x44xf32>
    %37 = math.tanh %36 : vector<8x44xf32>
    %cst_20 = arith.constant -0.99999988 : f32
    %cst_21 = arith.constant 0.99999988 : f32
    %38 = vector.broadcast %cst_20 : f32 to vector<8x44xf32>
    %39 = arith.maximumf %38, %37 : vector<8x44xf32>
    %40 = vector.broadcast %cst_21 : f32 to vector<8x44xf32>
    %41 = arith.minimumf %40, %39 : vector<8x44xf32>
    %cst_22 = arith.constant 0.000000e+00 : f32
    %42 = vector.broadcast %cst_22 : f32 to vector<8x44xf32>
    %43 = arith.select %29, %41, %42 : vector<8x44xi1>, vector<8x44xf32>
    %cst_23 = arith.constant -1.500000e+01 : f32
    %cst_24 = arith.constant 2.000000e+01 : f32
    %44 = vector.broadcast %cst_23 : f32 to vector<8x44xf32>
    %45 = arith.maximumf %44, %21 : vector<8x44xf32>
    %46 = vector.broadcast %cst_24 : f32 to vector<8x44xf32>
    %47 = arith.minimumf %46, %45 : vector<8x44xf32>
    %48 = math.exp %47 : vector<8x44xf32>
    %cst_25 = arith.constant 1.000000e+00 : f32
    %49 = vector.broadcast %cst_25 : f32 to vector<8x44xf32>
    %50 = arith.addf %49, %48 : vector<8x44xf32>
    %51 = math.log %50 : vector<8x44xf32>
    %cst_26 = arith.constant 2.000000e+01 : f32
    %52 = vector.broadcast %cst_26 : f32 to vector<8x44xf32>
    %53 = arith.cmpf ogt, %21, %52 : vector<8x44xf32>
    %cst_27 = arith.constant -1.500000e+01 : f32
    %54 = vector.broadcast %cst_27 : f32 to vector<8x44xf32>
    %55 = arith.cmpf olt, %21, %54 : vector<8x44xf32>
    %56 = math.exp %21 : vector<8x44xf32>
    %57 = arith.select %55, %56, %51 : vector<8x44xi1>, vector<8x44xf32>
    %58 = arith.select %53, %21, %57 : vector<8x44xi1>, vector<8x44xf32>
    %cst_28 = arith.constant 0.000000e+00 : f32
    %59 = vector.broadcast %cst_28 : f32 to vector<8x44xf32>
    %60 = arith.select %31, %58, %59 : vector<8x44xi1>, vector<8x44xf32>
    %61 = arith.mulf %43, %43 : vector<8x44xf32>
    %cst_29 = arith.constant 1.000000e+00 : f32
    %62 = vector.broadcast %cst_29 : f32 to vector<8x44xf32>
    %63 = arith.subf %62, %61 : vector<8x44xf32>
    %64 = math.log %63 : vector<8x44xf32>
    %cst_30 = arith.constant 5.000000e-01 : f32
    %65 = vector.broadcast %cst_30 : f32 to vector<8x44xf32>
    %66 = arith.mulf %65, %64 : vector<8x44xf32>
    %c0_31 = arith.constant 0 : index
    %c0_32 = arith.constant 0 : index
    %67 = vector.load %arg8[%c0_31, %c0_32] : memref<44x44xf32, #tpu.memory_space<vmem>>, vector<44x44xf32>
    %cst_33 = arith.constant dense<0.000000e+00> : vector<8x44xf32>
    %68 = tpu.matmul %66, %67, %cst_33 {dimension_numbers = #tpu.dot_dimension_numbers<[1], [0], [0], [1], [0, 0, 1, 1], [], []>} : vector<8x44xf32>, vector<44x44xf32>, vector<8x44xf32> -> vector<8x44xf32>
    %69 = math.exp %68 : vector<8x44xf32>
    %70 = arith.mulf %43, %69 : vector<8x44xf32>
    %cst_34 = arith.constant 0.000000e+00 : f32
    %71 = vector.broadcast %cst_34 : f32 to vector<8x44xf32>
    %72 = arith.select %24, %21, %71 : vector<8x44xi1>, vector<8x44xf32>
    %73 = arith.addf %72, %70 : vector<8x44xf32>
    %74 = arith.addf %73, %60 : vector<8x44xf32>
    %cst_35 = arith.constant 0.000000e+00 : f32
    %75 = vector.broadcast %cst_35 : f32 to vector<8x9xf32>
    %76 = arith.subf %75, %10 : vector<8x9xf32>
    %77 = math.exp %76 : vector<8x9xf32>
    %cst_36 = arith.constant 1.000000e+00 : f32
    %78 = vector.broadcast %cst_36 : f32 to vector<8x9xf32>
    %79 = arith.addf %78, %77 : vector<8x9xf32>
    %80 = tpu.reciprocal %79 {approx = true} : vector<8x9xf32> -> vector<8x9xf32>
    %c8_i32_37 = arith.constant 8 : i32
    %81 = vector.broadcast %c8_i32_37 : i32 to vector<8x9xi32>
    %82 = arith.cmpi eq, %6, %81 : vector<8x9xi32>
    %cst_38 = arith.constant 0.000000e+00 : f32
    %83 = vector.broadcast %cst_38 : f32 to vector<8x9xf32>
    %84 = arith.select %82, %80, %83 : vector<8x9xi1>, vector<8x9xf32>
    %c0_39 = arith.constant 0 : index
    %c0_40 = arith.constant 0 : index
    %85 = vector.load %arg9[%c0_39, %c0_40] : memref<44x73xf32, #tpu.memory_space<vmem>>, vector<44x73xf32>
    %cst_41 = arith.constant dense<0.000000e+00> : vector<8x73xf32>
    %86 = tpu.matmul %74, %85, %cst_41 {dimension_numbers = #tpu.dot_dimension_numbers<[1], [0], [0], [1], [0, 0, 1, 1], [], []>} : vector<8x44xf32>, vector<44x73xf32>, vector<8x73xf32> -> vector<8x73xf32>
    %c0_42 = arith.constant 0 : index
    %c0_43 = arith.constant 0 : index
    %87 = vector.load %arg10[%c0_42, %c0_43] : memref<9x73xf32, #tpu.memory_space<vmem>>, vector<9x73xf32>
    %cst_44 = arith.constant dense<0.000000e+00> : vector<8x73xf32>
    %88 = tpu.matmul %84, %87, %cst_44 {dimension_numbers = #tpu.dot_dimension_numbers<[1], [0], [0], [1], [0, 0, 1, 1], [], []>} : vector<8x9xf32>, vector<9x73xf32>, vector<8x73xf32> -> vector<8x73xf32>
    %89 = arith.addf %86, %88 : vector<8x73xf32>
    %c0_45 = arith.constant 0 : index
    %c0_46 = arith.constant 0 : index
    %90 = vector.load %arg11[%c0_45, %c0_46] : memref<8x73xf32, #tpu.memory_space<vmem>>, vector<8x73xf32>
    tpu.vector_store %arg11[%c0_45, %c0_46], %89 {strides = array<i32>} : memref<8x73xf32, #tpu.memory_space<vmem>>, vector<8x73xf32>,
    return
  }
  func.func @transform_0(%arg0: i32) -> (i32, i32) {
    %c0_i32 = arith.constant 0 : i32
    %c0_i32_0 = arith.constant 0 : i32
    return %arg0, %c0_i32 : i32, i32
  }
  func.func @transform_1(%arg0: i32) -> (i32, i32) {
    %c0_i32 = arith.constant 0 : i32
    %c0_i32_0 = arith.constant 0 : i32
    %c0_i32_1 = arith.constant 0 : i32
    return %c0_i32, %c0_i32_0 : i32, i32
  }
  func.func @transform_2(%arg0: i32) -> (i32, i32) {
    %c0_i32 = arith.constant 0 : i32
    %c0_i32_0 = arith.constant 0 : i32
    %c0_i32_1 = arith.constant 0 : i32
    return %c0_i32, %c0_i32_0 : i32, i32
  }
  func.func @transform_3(%arg0: i32) -> (i32, i32) {
    %c0_i32 = arith.constant 0 : i32
    %c0_i32_0 = arith.constant 0 : i32
    %c0_i32_1 = arith.constant 0 : i32
    return %c0_i32, %c0_i32_0 : i32, i32
  }
  func.func @transform_4(%arg0: i32) -> (i32, i32) {
    %c0_i32 = arith.constant 0 : i32
    %c0_i32_0 = arith.constant 0 : i32
    %c0_i32_1 = arith.constant 0 : i32
    return %c0_i32, %c0_i32_0 : i32, i32
  }
  func.func @transform_5(%arg0: i32) -> (i32, i32) {
    %c0_i32 = arith.constant 0 : i32
    %c0_i32_0 = arith.constant 0 : i32
    %c0_i32_1 = arith.constant 0 : i32
    return %c0_i32, %c0_i32_0 : i32, i32
  }
  func.func @transform_6(%arg0: i32) -> (i32, i32) {
    %c0_i32 = arith.constant 0 : i32
    %c0_i32_0 = arith.constant 0 : i32
    %c0_i32_1 = arith.constant 0 : i32
    return %c0_i32, %c0_i32_0 : i32, i32
  }
  func.func @transform_7(%arg0: i32) -> (i32, i32) {
    %c0_i32 = arith.constant 0 : i32
    %c0_i32_0 = arith.constant 0 : i32
    %c0_i32_1 = arith.constant 0 : i32
    return %c0_i32, %c0_i32_0 : i32, i32
  }
  func.func @transform_8(%arg0: i32) -> (i32, i32) {
    %c0_i32 = arith.constant 0 : i32
    %c0_i32_0 = arith.constant 0 : i32
    %c0_i32_1 = arith.constant 0 : i32
    return %c0_i32, %c0_i32_0 : i32, i32
  }
  func.func @transform_9(%arg0: i32) -> (i32, i32) {
    %c0_i32 = arith.constant 0 : i32
    %c0_i32_0 = arith.constant 0 : i32
    %c0_i32_1 = arith.constant 0 : i32
    return %c0_i32, %c0_i32_0 : i32, i32
  }
  func.func @transform_10(%arg0: i32) -> (i32, i32) {
    %c0_i32 = arith.constant 0 : i32
    %c0_i32_0 = arith.constant 0 : i32
    return %arg0, %c0_i32 : i32, i32
  }
}

</mosaic_0001>

<bundles_post_ra>
// kernel: deep_normal_forward.1
= control target key start
LH: loop header
LB: loop body
LE: loop exit
PB: predicated region body
PF: predicated region fallthrough
CT: control target
= control target key end

     0   :  { %15 = vsyncpa [#allocation3], 0  ;;  %s1210_s0 = inlined_call_operand.hbm [shape: f32[8,16], index: 0, kind: input, shape index: {}]   ;;  %s1211_s1 = inlined_call_operand.hbm [shape: f32[16,9], index: 1, kind: input, shape index: {}]   ;;  %s1212_s2 = inlined_call_operand.vmem [shape: f32[1,9], index: 2, kind: input, shape index: {}]   ;;  %s1213_s3 = inlined_call_operand.hbm [shape: f32[9,24], index: 3, kind: input, shape index: {}]   ;;  %s1214_s4 = inlined_call_operand.vmem [shape: f32[1,24], index: 4, kind: input, shape index: {}]   ;;  %s1215_s5 = inlined_call_operand.hbm [shape: f32[24,44], index: 5, kind: input, shape index: {}]   ;;  %s1216_s6 = inlined_call_operand.vmem [shape: f32[1,44], index: 6, kind: input, shape index: {}]   ;;  %s1217_s7 = inlined_call_operand.hbm [shape: f32[44,44], index: 7, kind: input, shape index: {}]   ;;  %s1218_s8 = inlined_call_operand.hbm [shape: f32[44,73], index: 8, kind: input, shape index: {}]   ;;  %s1219_s9 = inlined_call_operand.vmem [shape: f32[9,73], index: 9, kind: input, shape index: {}]   ;;  %s1220_s10 = inlined_call_operand.vmem [shape: f32[8,73], index: 10, kind: output, shape index: {}]  }
   0x1   :  { %16 = vsyncpa [#allocation5], 0 }
   0x2   :  { %17 = vsyncpa [#allocation8], 0 }
   0x3   :  { %18 = vsyncpa [#allocation11], 0  ;;  %s982_s13 = smov [#allocation4]   ;;  %s842_s17 = scalar_lea.hbm %s1211_s1, 256 }
   0x4   :  { %s34_s14 = sshll.u32 %s982_s13, 4  ;;  %p843_p0 = scmp.ne.s32.totalorder %s1211_s1, %s842_s17  ;;  %s35_s14 = int_to_ptr.vmem [resolvable:$true] %s34_s14 }
   0x5   :  { %p846_p1 = scmp.lt.u32.totalorder %s842_s17, %s1211_s1 }
   0x7   :  { %p848_p2 = pnand %p846_p1, %p843_p0 }
   0x9   :  { %851 = shalt.err (!%p848_p2)
}
   0xa   :  { %s852_s22 = scalar_lea.vmem %s35_s14, 256  ;;  %p857_p4 = scmp.lt.s32.totalorder %s35_s14, %s35_s14 }
   0xb   :  { %p853_p3 = scmp.ne.s32.totalorder %s35_s14, %s852_s22  ;;  %p858_p5 = scmp.lt.s32.totalorder %s852_s22, %s852_s22 }
   0xd   :  { %p859_p6 = por %p858_p5, %p857_p4 }
   0xf   :  { %p860_p7 = pnand %p859_p6, %p853_p3 }
  0x11   :  { %863 = shalt.err (!%p860_p7)
}
  0x12   :  { %s983_s23 = smov 128   ;;  %s984_s24 = smov 8  }
  0x13   :  { %40 = dma.hbm_to_vmem [thread:$0]  %s1211_s1, 256, %s35_s14, [#allocation5], %s983_s23, %s983_s23, %s984_s24  }
  0x14   :  { %s985_s27 = smov [#allocation7]   ;;  %s986_s29 = smov [#allocation2]  }
  0x15   :  { %s62_s28 = sshll.u32 %s985_s27, 4  ;;  %s25_s30 = sshll.u32 %s986_s29, 4  ;;  %s63_s28 = int_to_ptr.vmem [resolvable:$true] %s62_s28  ;;  %s26_s30 = int_to_ptr.vmem [resolvable:$true] %s25_s30 }
  0x16   :  { %s864_s13 = scalar_lea.hbm %s1215_s5, 384 }
  0x17   :  { %p865_p8 = scmp.ne.s32.totalorder %s1215_s5, %s864_s13  ;;  %p868_p9 = scmp.lt.u32.totalorder %s864_s13, %s1215_s5 }
  0x19   :  { %p870_p10 = pnand %p868_p9, %p865_p8 }
  0x1b   :  { %873 = shalt.err (!%p870_p10)
}
  0x1c   :  { %s874_s1 = scalar_lea.vmem %s63_s28, 384  ;;  %p879_p12 = scmp.lt.s32.totalorder %s63_s28, %s63_s28 }
  0x1d   :  { %p875_p11 = scmp.ne.s32.totalorder %s63_s28, %s874_s1  ;;  %p880_p13 = scmp.lt.s32.totalorder %s874_s1, %s874_s1 }
  0x1f   :  { %p881_p0 = por %p880_p13, %p879_p12 }
  0x21   :  { %p882_p1 = pnand %p881_p0, %p875_p11 }
  0x23   :  { %885 = shalt.err (!%p882_p1)
}
  0x24   :  { %68 = dma.hbm_to_vmem [thread:$0]  %s1215_s5, 384, %s63_s28, [#allocation8], %s983_s23, %s983_s23, %s984_s24  }
  0x25   :  { %s886_s22 = scalar_lea.hbm %s1210_s0, 128 }
  0x26   :  { %p887_p2 = scmp.ne.s32.totalorder %s1210_s0, %s886_s22  ;;  %p890_p3 = scmp.lt.u32.totalorder %s886_s22, %s1210_s0 }
  0x28   :  { %p892_p4 = pnand %p890_p3, %p887_p2 }
  0x2a   :  { %895 = shalt.err (!%p892_p4)
}
  0x2b   :  { %s896_s11 = scalar_lea.vmem %s26_s30, 128  ;;  %p901_p6 = scmp.lt.s32.totalorder %s26_s30, %s26_s30 }
  0x2c   :  { %p897_p5 = scmp.ne.s32.totalorder %s26_s30, %s896_s11  ;;  %p902_p7 = scmp.lt.s32.totalorder %s896_s11, %s896_s11 }
  0x2e   :  { %p903_p8 = por %p902_p7, %p901_p6 }
  0x30   :  { %p904_p9 = pnand %p903_p8, %p897_p5 }
  0x32   :  { %907 = shalt.err (!%p904_p9)
}
  0x33   :  { %28 = dma.hbm_to_vmem [thread:$0]  %s1210_s0, 128, %s26_s30, [#allocation3]  }
  0x34   :  { %s987_s12 = smov [#allocation6]   ;;  %s988_s15 = smov [#allocation9]  }
  0x35   :  { %s48_s13 = sshll.u32 %s987_s12, 4  ;;  %s76_s16 = sshll.u32 %s988_s15, 4  ;;  %s49_s13 = int_to_ptr.vmem [resolvable:$true] %s48_s13  ;;  %s77_s16 = int_to_ptr.vmem [resolvable:$true] %s76_s16 }
  0x36   :  { %s908_s1 = scalar_lea.hbm %s1213_s3, 256 }
  0x37   :  { %p909_p10 = scmp.ne.s32.totalorder %s1213_s3, %s908_s1  ;;  %p912_p11 = scmp.lt.u32.totalorder %s908_s1, %s1213_s3 }
  0x39   :  { %p914_p12 = pnand %p912_p11, %p909_p10 }
  0x3b   :  { %917 = shalt.err (!%p914_p12)
}
  0x3c   :  { %s918_s0 = scalar_lea.vmem %s49_s13, 256  ;;  %p923_p0 = scmp.lt.s32.totalorder %s49_s13, %s49_s13 }
  0x3d   :  { %p919_p13 = scmp.ne.s32.totalorder %s49_s13, %s918_s0  ;;  %p924_p1 = scmp.lt.s32.totalorder %s918_s0, %s918_s0 }
  0x3f   :  { %p925_p2 = por %p924_p1, %p923_p0 }
  0x41   :  { %p926_p3 = pnand %p925_p2, %p919_p13 }
  0x43   :  { %929 = shalt.err (!%p926_p3)
}
  0x44   :  { %54 = dma.hbm_to_vmem [thread:$0]  %s1213_s3, 256, %s49_s13, [#allocation5], %s983_s23, %s983_s23, %s984_s24  }
  0x45   :  { %s930_s27 = scalar_lea.hbm %s1217_s7, 768 }
  0x46   :  { %p931_p4 = scmp.ne.s32.totalorder %s1217_s7, %s930_s27  ;;  %p934_p5 = scmp.lt.u32.totalorder %s930_s27, %s1217_s7 }
  0x48   :  { %p936_p6 = pnand %p934_p5, %p931_p4 }
  0x4a   :  { %939 = shalt.err (!%p936_p6)
}
  0x4b   :  { %s940_s12 = scalar_lea.vmem %s77_s16, 768  ;;  %p945_p8 = scmp.lt.s32.totalorder %s77_s16, %s77_s16 }
  0x4c   :  { %p941_p7 = scmp.ne.s32.totalorder %s77_s16, %s940_s12  ;;  %p946_p9 = scmp.lt.s32.totalorder %s940_s12, %s940_s12 }
  0x4e   :  { %p947_p10 = por %p946_p9, %p945_p8 }
  0x50   :  { %p948_p11 = pnand %p947_p10, %p941_p7 }
  0x52   :  { %951 = shalt.err (!%p948_p11)
}
  0x53   :  { %82 = dma.hbm_to_vmem [thread:$0]  %s1217_s7, 768, %s77_s16, [#allocation8], %s983_s23, %s983_s23, %s984_s24  }
  0x54   :  { %s989_s15 = smov [#allocation10]   ;;  %s952_s14 = scalar_lea.hbm %s1218_s8, 768 }
  0x55   :  { %s88_s17 = sshll.u32 %s989_s15, 4  ;;  %p953_p12 = scmp.ne.s32.totalorder %s1218_s8, %s952_s14  ;;  %s89_s17 = int_to_ptr.vmem [resolvable:$true] %s88_s17 }
  0x56   :  { %p956_p13 = scmp.lt.u32.totalorder %s952_s14, %s1218_s8 }
  0x58   :  { %p958_p0 = pnand %p956_p13, %p953_p12 }
  0x5a   :  { %961 = shalt.err (!%p958_p0)
}
  0x5b   :  { %s962_s30 = scalar_lea.vmem %s89_s17, 768  ;;  %p967_p2 = scmp.lt.s32.totalorder %s89_s17, %s89_s17 }
  0x5c   :  { %p963_p1 = scmp.ne.s32.totalorder %s89_s17, %s962_s30  ;;  %p968_p3 = scmp.lt.s32.totalorder %s962_s30, %s962_s30 }
  0x5e   :  { %p969_p4 = por %p968_p3, %p967_p2 }
  0x60   :  { %p970_p5 = pnand %p969_p4, %p963_p1 }
  0x62   :  { %973 = shalt.err (!%p970_p5)
}
  0x63   :  { %94 = dma.hbm_to_vmem [thread:$0]  %s1218_s8, 768, %s89_s17, [#allocation11], %s983_s23, %s983_s23, %s984_s24  }
  0x64   :  { %974 = dma.done.wait [#allocation3], 128  }
  0x65   :  { %975 = vsyncadd [#allocation3], 4294967168 }
  0x66   :  { %976 = dma.done.wait [#allocation5], 512  }
  0x67   :  { %977 = vsyncadd [#allocation5], 4294966784 }
  0x68   :  { %978 = dma.done.wait [#allocation8], 1152  }
  0x69   :  { %979 = vsyncadd [#allocation8], 4294966144 }
  0x6a   :  { %980 = dma.done.wait [#allocation11], 768  }
  0x6b   :  { %981 = vsyncadd [#allocation11], 4294966528  ;;  %v990_v0 = vmov 0.0|0.0   ;;  %vm991_vm0 = vmmov 0   ;;  %v992_v1 = vmov 0.0   ;;  %v116_v2 = vld [vmem:[#allocation4] sm:$0xff]  ;;  %v199_v14 = vlaneseq }
  0x6c   :  { %774 = vmatprep.subr.bf16.mxu1 %v990_v0  ;;  %718 = vmatprep.mubr.msk.f32.mxu1 %vm991_vm0, %v992_v1  ;;  %v117_v3 = vld [vmem:[#allocation4 + $0x8] sm:$0xff]  ;;  %v115_v5 = vld [vmem:[#allocation2] sm:$0xff]  ;;  %vm125_vm1 = vcmask 130048   ;;  %v204_v6 = vld [vmem:[#allocation6] sm:$0xff]  ;;  %vm217_vm2 = vcmask 1040384   ;;  %vm993_vm3 = vmmov 1  }
  0x6d   :  { %781 = vmatprep.subr.bf16.mxu0 %v990_v0  ;;  %734 = vmatprep.mubr.msk.f32.mxu0 %vm991_vm0, %v992_v1  ;;  %v775_v4 = vpack.c.bf16 %v117_v3, %v116_v2  ;;  %v205_v7 = vld [vmem:[#allocation6 + $0x8] sm:$0x1]  ;;  %vm1146_vm4 = vmpackc.low %vm217_vm2, %vm993_vm3  ;;  %v1156_v15 = vand.u32 127, %v199_v14  ;;  %vm213_vm6 = vcmask 72704   ;;  %v292_v18 = vld [vmem:[#allocation7] sm:$0xff]  ;;  %vm302_vm7 = vcmask 195584  }
  0x6e   :  { %v778_v8 = vpack.c.bf16 %v205_v7, %v204_v6  ;;  %v673_v10 = vld [vmem:[%s1212_s2] ss:$0 sm:$0xff]  ;;  %v293_v19 = vld [vmem:[#allocation7 + $0x8] sm:$0xff]  ;;  %v294_v21 = vld [vmem:[#allocation7 + $0x10] sm:$0xff]  ;;  %vm416_vm9 = vcmask 1043456   ;;  %vm412_vm15 = vcmask 359424  }
  0x6f   :  { %776 = vmatpush3.bf16.msra.mxu1 %v775_v4  ;;  %vm201_vm5 = vcmp.lt.s32.totalorder %v1156_v15, 8  ;;  %v782_v20 = vpack.c.bf16 %v293_v19, %v292_v18  ;;  %v675_v25 = vld [vmem:[%s1214_s4] ss:$0 sm:$0xff]  ;;  %v510_v31 = vld [vmem:[%s1219_s9 + $0x8] sm:$0x1]  ;;  %vm501_vm8 = vcmp.eq.s32.totalorder %v1156_v15, 8  ;;  %vm1187_vm10 = vmpackc.low %vm416_vm9, %vm993_vm3 }
  0x70   :  { %777 = vmatprep.subr.bf16.mxu1 %v990_v0  ;;  %v509_v30 = vld [vmem:[%s1219_s9] sm:$0xff]  ;;  %v407_v37 = vld [vmem:[#allocation9 + $0x8] sm:$0xff]  ;;  %v408_v38 = vld [vmem:[#allocation9 + $0x10] sm:$0xff]  ;;  %vm376_vm12 = vcmp.ge.s32.totalorder %v1156_v15, 8  ;;  %vm377_vm13 = vcmp.lt.s32.totalorder %v1156_v15, 36  ;;  %vm379_vm2 = vcmp.ge.s32.totalorder %v1156_v15, 36 }
  0x71   :  { %783 = vmatpush3.bf16.msra.mxu0 %v782_v20  ;;  %v795_v32 = vpack.c.bf16 %v510_v31, %v509_v30  ;;  %v406_v36 = vld [vmem:[#allocation9] sm:$0xff]  ;;  %v409_v40 = vld [vmem:[#allocation9 + $0x18] sm:$0xff]  ;;  %v411_v43 = vld [vmem:[#allocation9 + $0x28] sm:$0xf]  ;;  %vm663_vm3 = vcmask 596992  }
  0x72   :  { %719 = vmatmul.mubr.msk.f32.vlgmr.msra.gmra.mrb[0].mxu1 %vm125_vm1, %v115_v5  ;;  %732 = vmatprep.subr.mxu0 %v992_v1  ;;  %v785_v39 = vpack.c.bf16 %v407_v37, %v406_v36  ;;  %v788_v41 = vpack.c.bf16 %v409_v40, %v408_v38  ;;  %v410_v42 = vld [vmem:[#allocation9 + $0x20] sm:$0xff]  ;;  %vm378_vm14 = vmand %vm376_vm12, %vm377_vm13  ;;  %v503_v60 = vld [vmem:[#allocation10] sm:$0xff] }
  0x73   :  { %725 = vmatprep.mubr.msk.f32.mxu1 %vm991_vm0, %v992_v1  ;;  %780 = vmatpush3.bf16.msk.msra.mxu1 %vm1146_vm4, %v778_v8  ;;  %v791_v44 = vpack.c.bf16 %v411_v43, %v410_v42  ;;  %v678_v46 = vld [vmem:[%s1216_s6] ss:$0 sm:$0xff]  ;;  %v504_v61 = vld [vmem:[#allocation10 + $0x8] sm:$0xff]  ;;  %v507_v3 = vld [vmem:[#allocation10 + $0x20] sm:$0xff] }
  0x74   :  { %784 = vmatprep.subr.bf16.mxu1 %v990_v0  ;;  %v799_v62 = vpack.c.bf16 %v504_v61, %v503_v60  ;;  %v505_v63 = vld [vmem:[#allocation10 + $0x10] sm:$0xff]  ;;  %v508_v4 = vld [vmem:[#allocation10 + $0x28] sm:$0xf] }
  0x75   :  { %733 = vmatpush3.msra.mxu0 %v294_v21  ;;  %v805_v5 = vpack.c.bf16 %v508_v4, %v507_v3 }
  0x76   :  { %794 = vmatprep.subr.bf16.mxu0 %v990_v0 }
 0x145   :  { %v195_v11 = vpop.f32.mrb[0].mxu1 }
 0x146   :  { %v196_v12 = vadd.f32 %v673_v10, %v195_v11  ;;  %v720_v13 = vpop.f32.mrb[1].mxu1 }
 0x148   :  { %822 = vtanh.f32 %v196_v12 }
 0x152   :  { %v823_v16 = vpop.eup %822 }
 0x153   :  { %v203_v17 = vsel %vm201_vm5, %v823_v16, %v196_v12 }
 0x154   :  { %726 = vmatmul.mubr.msk.f32.vlgmr.msra.gmra.mrb[2].mxu1 %vm213_vm6, %v203_v17  ;;  %v496_v22 = vsub.f32 0.0, %v203_v17 }
 0x155   :  { %749 = vmatprep.mubr.msk.f32.mxu1 %vm991_vm0, %v992_v1  ;;  %786 = vmatpush3.bf16.msra.mxu1 %v785_v39 }
 0x156   :  { %v497_v23 = vmul.f32 1.442695, %v496_v22  ;;  %787 = vmatprep.subr.bf16.mxu1 %v990_v0 }
 0x158   :  { %824 = vpow2.f32 %v497_v23 }
 0x159   :  { %789 = vmatpush3.bf16.msra.mxu1 %v788_v41 }
 0x15a   :  { %790 = vmatprep.subr.bf16.mxu1 %v990_v0 }
 0x15d   :  { %793 = vmatpush3.bf16.msk.msra.mxu1 %vm1187_vm10, %v791_v44 }
 0x162   :  { %v825_v24 = vpop.eup %824 }
 0x163   :  { %v499_v26 = vadd.f32 1.0, %v825_v24 }
 0x227   :  { %v287_v27 = vpop.f32.mrb[2].mxu1 }
 0x228   :  { %v288_v28 = vadd.f32 %v675_v25, %v287_v27  ;;  %v727_v29 = vpop.f32.mrb[3].mxu1 }
 0x22a   :  { %826 = vtanh.f32 %v288_v28 }
 0x22b   :  { %828 = vrcp.f32 %v499_v26 }
 0x234   :  { %v827_v33 = vpop.eup %826 }
 0x235   :  { %v829_v34 = vpop.eup %828  ;;  %735 = vmatmul.mubr.msk.f32.vlgmr.msra.gmra.mrb[0].mxu0 %vm302_vm7, %v827_v33 }
 0x236   :  { %797 = vmatpush3.bf16.msk.msra.mxu0 %vm1146_vm4, %v795_v32  ;;  %756 = vmatprep.mubr.msk.f32.mxu0 %vm991_vm0, %v992_v1  ;;  %v502_v35 = vsel %vm501_vm8, %v829_v34, 0.0 }
 0x237   :  { %798 = vmatprep.subr.bf16.mxu0 %v990_v0 }
 0x239   :  { %757 = vmatmul.mubr.msk.f32.vlgmr.msra.gmra.mrb[2].mxu0 %vm213_vm6, %v502_v35 }
 0x23a   :  { %771 = vmatprep.mubr.msk.f32.mxu0 %vm991_vm0, %v992_v1  ;;  %800 = vmatpush3.bf16.msra.mxu0 %v799_v62  ;;  %v506_v1 = vld [vmem:[#allocation10 + $0x18] sm:$0xff] }
 0x23b   :  { %801 = vmatprep.subr.bf16.mxu0 %v990_v0  ;;  %v802_v2 = vpack.c.bf16 %v506_v1, %v505_v63 }
 0x23e   :  { %803 = vmatpush3.bf16.msra.mxu0 %v802_v2 }
 0x23f   :  { %804 = vmatprep.subr.bf16.mxu0 %v990_v0 }
 0x242   :  { %807 = vmatpush3.bf16.msk.msra.mxu0 %vm1187_vm10, %v805_v5 }
 0x308   :  { %v372_v47 = vpop.f32.mrb[0].mxu0 }
 0x309   :  { %v373_v48 = vadd.f32 %v678_v46, %v372_v47  ;;  %v736_v49 = vpop.f32.mrb[1].mxu0 }
 0x30b   :  { %vm380_vm11 = vcmp.ge.f32.partialorder %v373_v48, 0.0  ;;  %v381_v50 = vmul.f32 0.01, %v373_v48  ;;  %v387_v6 = vmax.f32 %v373_v48, -15.0  ;;  %v396_v11 = vmul.f32 1.442695, %v373_v48 }
 0x30c   :  { %vm395_vm0 = vcmp.lt.f32.partialorder %v373_v48, -15.0  ;;  %vm394_vm1 = vcmp.gt.f32.partialorder %v373_v48, 20.0  ;;  %v493_v22 = vsel %vm201_vm5, %v373_v48, 0.0 }
 0x30d   :  { %v382_v51 = vsel %vm380_vm11, %v373_v48, %v381_v50  ;;  %v388_v7 = vmin.f32 %v387_v6, 20.0 }
 0x30e   :  { %830 = vtanh.f32 %v382_v51 }
 0x30f   :  { %v389_v8 = vmul.f32 1.442695, %v388_v7 }
 0x318   :  { %v831_v52 = vpop.eup %830 }
 0x319   :  { %v680_v53 = vclamps-f32 %v831_v52, 0.9999999 }
 0x31b   :  { %v386_v54 = vsel %vm378_vm14, %v680_v53, 0.0 }
 0x31c   :  { %v401_v55 = vmul.f32 %v386_v54, %v386_v54 }
 0x31e   :  { %v402_v56 = vsub.f32 1.0, %v401_v55 }
 0x320   :  { %832 = vlog2.f32 %v402_v56 }
 0x321   :  { %834 = vpow2.f32 %v389_v8 }
 0x32a   :  { %v833_v57 = vpop.eup %832 }
 0x32b   :  { %v404_v58 = vmul.f32 0.6931472, %v833_v57  ;;  %v835_v9 = vpop.eup %834 }
 0x32c   :  { %v391_v10 = vadd.f32 1.0, %v835_v9 }
 0x32d   :  { %v405_v59 = vmul.f32 0.5, %v404_v58 }
 0x32e   :  { %836 = vlog2.f32 %v391_v10 }
 0x32f   :  { %750 = vmatmul.mubr.msk.f32.vlgmr.msra.gmra.mrb[4].mxu1 %vm412_vm15, %v405_v59  ;;  %838 = vpow2.f32 %v396_v11 }
 0x338   :  { %v837_v0 = vpop.eup %836 }
 0x339   :  { %v393_v16 = vmul.f32 0.6931472, %v837_v0  ;;  %v839_v17 = vpop.eup %838 }
 0x33b   :  { %v398_v18 = vsel %vm395_vm0, %v839_v17, %v393_v16 }
 0x33c   :  { %v399_v21 = vsel %vm394_vm1, %v373_v48, %v398_v18 }
 0x33d   :  { %v400_v24 = vsel %vm379_vm2, %v399_v21, 0.0 }
 0x402   :  { %v486_v12 = vpop.f32.mrb[4].mxu1 }
 0x403   :  { %v490_v13 = vmul.f32 1.442695, %v486_v12  ;;  %v751_v14 = vpop.f32.mrb[5].mxu1 }
 0x405   :  { %840 = vpow2.f32 %v490_v13 }
 0x40f   :  { %v841_v19 = vpop.eup %840 }
 0x410   :  { %v492_v20 = vmul.f32 %v841_v19, %v386_v54 }
 0x412   :  { %v494_v23 = vadd.f32 %v493_v22, %v492_v20 }
 0x414   :  { %v495_v25 = vadd.f32 %v494_v23, %v400_v24 }
 0x416   :  { %772 = vmatmul.mubr.msk.f32.vlgmr.msra.gmra.mrb[2].mxu0 %vm412_vm15, %v495_v25 }
 0x4e9   :  { %v659_v26 = vpop.f32.mrb[2].mxu0 }
 0x4ea   :  { %664 = vst.msk [vmem:[%s1220_s10] sm:$0xff] %vm663_vm3, %v659_v26  ;;  %v773_v27 = vpop.f32.mrb[3].mxu0 }
 0x4eb   :  { %669 = vsyncpa [#allocation3], 1 }
 0x4ec   :  { %670 = vsyncpa [#allocation5], 1 }
 0x4ed   :  { %671 = vsyncpa [#allocation8], 1 }
 0x4ee   :  { %672 = vsyncpa [#allocation11], 1 }

</bundles_post_ra>
